<compile_context>
chip_gen: v7x
topology: tpu7x:2x2x1
jax: 0.10.0
libtpu: 0.0.40
codegen_flags: <defaults>
</compile_context>

<pallas_src>
import jax
import jax.numpy as jnp
from jax.experimental import pallas as pl
from jax.experimental.pallas import tpu as pltpu


def _identity_strain_dma_kernel(coord_hbm, cell_hbm, sco_hbm, scell_hbm, sem):
    # strain == I  =>  bmm(x, I) == x : materialize outputs with two
    # overlapped HBM->HBM DMA copies (start both, then wait on both).
    coord_cp = pltpu.make_async_copy(coord_hbm, sco_hbm, sem.at[0])
    cell_cp = pltpu.make_async_copy(cell_hbm, scell_hbm, sem.at[1])
    coord_cp.start()
    cell_cp.start()
    coord_cp.wait()
    cell_cp.wait()


def cell_scale_inducer(coordinates, cell):
    """coordinates: (B, N, D) float, cell: (B, D, D) float.

    Returns (strained_coordinates, strained_cell, strain) with the same
    forward semantics as the PyTorch CellScaleInducer.forward.
    """
    B, N, D = coordinates.shape
    assert cell.shape == (B, D, D)
    dtype = coordinates.dtype

    # Batch-invariant identity strain: built once at the JAX level instead of
    # recomputing iotas / issuing tiny masked stores inside a kernel.
    strain = jnp.broadcast_to(jnp.eye(D, dtype=dtype), (B, D, D))

    # NOTE: if callers never need fresh buffers, the fastest implementation is
    # `return coordinates, cell, strain` with no kernel at all (identity bmm).
    # TODO(synk): if callers can donate inputs, add input_output_aliases to
    # make the copies in-place no-ops as well.
    strained_coordinates, strained_cell = pl.pallas_call(
        _identity_strain_dma_kernel,
        out_shape=(
            jax.ShapeDtypeStruct((B, N, D), dtype),
            jax.ShapeDtypeStruct((B, D, D), dtype),
        ),
        in_specs=[
            pl.BlockSpec(memory_space=pl.ANY),  # coordinates stay in HBM
            pl.BlockSpec(memory_space=pl.ANY),  # cell stays in HBM
        ],
        out_specs=(
            pl.BlockSpec(memory_space=pl.ANY),
            pl.BlockSpec(memory_space=pl.ANY),
        ),
        scratch_shapes=[pltpu.SemaphoreType.DMA((2,))],
    )(coordinates, cell)

    return strained_coordinates, strained_cell, strain


if __name__ == "__main__":
    key = jax.random.PRNGKey(0)
    k1, k2 = jax.random.split(key)

    B, N, D = 2, 8, 3
    coordinates = jax.random.normal(k1, (B, N, D), dtype=jnp.float32)
    cell = jax.random.normal(k2, (B, D, D), dtype=jnp.float32)

    sco, scell, strain = cell_scale_inducer(coordinates, cell)
    jax.block_until_ready((sco, scell, strain))

    # Reference check (strain is identity => bmm is identity on inputs).
    eye = jnp.broadcast_to(jnp.eye(D, dtype=jnp.float32), (B, D, D))
    assert jnp.allclose(sco, coordinates, atol=1e-6)
    assert jnp.allclose(scell, cell, atol=1e-6)
    assert jnp.allclose(strain, eye)

    print("KERNEL_OK")
</pallas_src>

<mosaic_0001>
module attributes {stable_mosaic.version = 11 : i64} {
  func.func @_identity_strain_dma_kernel(%arg0: memref<2x8x3xf32, #tpu.memory_space<any>>, %arg1: memref<2x3x3xf32, #tpu.memory_space<any>>, %arg2: memref<2x8x3xf32, #tpu.memory_space<any>>, %arg3: memref<2x3x3xf32, #tpu.memory_space<any>>, %arg4: memref<2x!tpu.dma_semaphore, #tpu.memory_space<semaphore_mem>>) attributes {dimension_semantics = [], scalar_prefetch = 0 : i64, scratch_operands = 1 : i64, tpu.core_type = #tpu.core_type<tc>} {
    %c0_i32 = arith.constant 0 : i32
    %0 = tpu.memref_slice %arg4[%c0_i32] : memref<2x!tpu.dma_semaphore, #tpu.memory_space<semaphore_mem>> -> memref<1x!tpu.dma_semaphore, #tpu.memory_space<semaphore_mem>>
    %1 = tpu.memref_squeeze %0 : memref<1x!tpu.dma_semaphore, #tpu.memory_space<semaphore_mem>> -> memref<!tpu.dma_semaphore, #tpu.memory_space<semaphore_mem>>
    tpu.enqueue_dma source(%arg0 : memref<2x8x3xf32, #tpu.memory_space<any>>) target(%arg2 : memref<2x8x3xf32, #tpu.memory_space<any>>) target_semaphore(%1 : memref<!tpu.dma_semaphore, #tpu.memory_space<semaphore_mem>>)
    %c1_i32 = arith.constant 1 : i32
    %2 = tpu.memref_slice %arg4[%c1_i32] : memref<2x!tpu.dma_semaphore, #tpu.memory_space<semaphore_mem>> -> memref<1x!tpu.dma_semaphore, #tpu.memory_space<semaphore_mem>>
    %3 = tpu.memref_squeeze %2 : memref<1x!tpu.dma_semaphore, #tpu.memory_space<semaphore_mem>> -> memref<!tpu.dma_semaphore, #tpu.memory_space<semaphore_mem>>
    tpu.enqueue_dma source(%arg1 : memref<2x3x3xf32, #tpu.memory_space<any>>) target(%arg3 : memref<2x3x3xf32, #tpu.memory_space<any>>) target_semaphore(%3 : memref<!tpu.dma_semaphore, #tpu.memory_space<semaphore_mem>>)
    %c0_i32_0 = arith.constant 0 : i32
    %4 = tpu.memref_slice %arg4[%c0_i32_0] : memref<2x!tpu.dma_semaphore, #tpu.memory_space<semaphore_mem>> -> memref<1x!tpu.dma_semaphore, #tpu.memory_space<semaphore_mem>>
    %5 = tpu.memref_squeeze %4 : memref<1x!tpu.dma_semaphore, #tpu.memory_space<semaphore_mem>> -> memref<!tpu.dma_semaphore, #tpu.memory_space<semaphore_mem>>
    tpu.wait_dma2 semaphore(%5 : memref<!tpu.dma_semaphore, #tpu.memory_space<semaphore_mem>>) src(%arg0 : memref<2x8x3xf32, #tpu.memory_space<any>>) dst(%arg2 : memref<2x8x3xf32, #tpu.memory_space<any>>)
    %c1_i32_1 = arith.constant 1 : i32
    %6 = tpu.memref_slice %arg4[%c1_i32_1] : memref<2x!tpu.dma_semaphore, #tpu.memory_space<semaphore_mem>> -> memref<1x!tpu.dma_semaphore, #tpu.memory_space<semaphore_mem>>
    %7 = tpu.memref_squeeze %6 : memref<1x!tpu.dma_semaphore, #tpu.memory_space<semaphore_mem>> -> memref<!tpu.dma_semaphore, #tpu.memory_space<semaphore_mem>>
    tpu.wait_dma2 semaphore(%7 : memref<!tpu.dma_semaphore, #tpu.memory_space<semaphore_mem>>) src(%arg1 : memref<2x3x3xf32, #tpu.memory_space<any>>) dst(%arg3 : memref<2x3x3xf32, #tpu.memory_space<any>>)
    return
  }
}

</mosaic_0001>

<bundles_post_ra>
// kernel: tpu_custom_call.1
= control target key start
LH: loop header
LB: loop body
LE: loop exit
PB: predicated region body
PF: predicated region fallthrough
CT: control target
= control target key end

     0   :  { %s191_s0 = inlined_call_operand.vmem [shape: f32[2,8,3], index: 0, kind: input, shape index: {}]   ;;  %s192_s1 = inlined_call_operand.vmem [shape: f32[2,3,3], index: 1, kind: input, shape index: {}]   ;;  %s193_s2 = inlined_call_operand.vmem [shape: f32[2,8,3], index: 2, kind: output, shape index: {0}]   ;;  %s194_s3 = inlined_call_operand.vmem [shape: f32[2,3,3], index: 3, kind: output, shape index: {1}]  }
   0x1   :  { %v41_v0 = vld [vmem:[%s191_s0] sm:$0xff]  ;;  %v43_v1 = vld [vmem:[%s191_s0 + $0x8] sm:$0xff] }
   0x2   :  { %42 = vst [vmem:[%s193_s2] sm:$0xff] %v41_v0  ;;  %44 = vst [vmem:[%s193_s2 + $0x8] sm:$0xff] %v43_v1 }
   0x3   :  { %52 = vsyncadd [#allocation2], 256  ;;  %v71_v2 = vld [vmem:[%s192_s1] sm:$0x7]  ;;  %v73_v3 = vld [vmem:[%s192_s1 + $0x4] sm:$0x7] }
   0x4   :  { %72 = vst [vmem:[%s194_s3] sm:$0x7] %v71_v2  ;;  %74 = vst [vmem:[%s194_s3 + $0x4] sm:$0x7] %v73_v3 }
   0x5   :  { %101 = vsyncadd [#allocation2 + $0x1], 96 }
   0x6   :  { %143 = dma.done.wait [#allocation2], 256 }
   0x7   :  { %144 = vsyncadd [#allocation2], 4294967040 }
   0x8   :  { %145 = dma.done.wait [#allocation2 + $0x1], 96 }
   0x9   :  { %146 = vsyncadd [#allocation2 + $0x1], 4294967200 }
   0xa   :  { %110 = vsyncmov [#allocation2] }
   0xd   :  { %s111_s2 = vpop.sfrf %110 }
   0xe   :  { %p141_p0 = scmp.ne.s32.totalorder %s111_s2, 0 }
  0x10   :  { %115 = shalt.err (%p141_p0)  }
  0x11   :  { %117 = vsyncmov [#allocation2 + $0x1] }
  0x14   :  { %s118_s27 = vpop.sfrf %117 }
  0x15   :  { %p142_p1 = scmp.ne.s32.totalorder %s118_s27, 0 }
  0x17   :  { %122 = shalt.err (%p142_p1)  }

</bundles_post_ra>
